<compile_context>
chip_gen: v7x
topology: tpu7x:2x2x1
jax: 0.10.0
libtpu: 0.0.40
codegen_flags: <defaults>
</compile_context>

<pallas_src>
import jax
import jax.numpy as jnp
from jax.experimental import pallas as pl
from jax.experimental.pallas import tpu as pltpu


# ----------------------------- Pallas kernel -------------------------------- #

def _revgrad_bwd_kernel(alpha_ref, g_ref, o_ref):
    """grad_input tile = -alpha * grad_output tile (alpha read from SMEM)."""
    neg_alpha = -alpha_ref[0]                      # f32 scalar, runtime operand
    g = g_ref[...]
    if jnp.issubdtype(o_ref.dtype, jnp.floating) and jnp.dtype(o_ref.dtype).itemsize < 4:
        # bf16 / f16: multiply in the native dtype (skip the upcast round trip).
        o_ref[...] = g * neg_alpha.astype(o_ref.dtype)
    else:
        o_ref[...] = (g.astype(jnp.float32) * neg_alpha).astype(o_ref.dtype)


# ----------------------------- backward wrapper ----------------------------- #

_LANE_CANDIDATES = (1024, 512, 256, 128)   # lane-dense last dim (multiples of 128)
_TARGET_TILE_BYTES = 4 * 1024 * 1024       # ~4 MiB/buffer -> ~16 MiB resident (2x in + 2x out)


def _cdiv(a, b):
    return -(-a // b)


def _pick_tile_rows(rows, lanes, itemsize, sub):
    """Rows per block: ~_TARGET_TILE_BYTES per buffer, >=2 blocks when possible,
    even block count when cheap (v7x has 2 TensorCores)."""
    tm_target = max(sub, (_TARGET_TILE_BYTES // (lanes * itemsize)) // sub * sub)
    if rows < 2 * sub:
        return rows                                    # single full-dim block
    # At least two blocks so both v7x TCs (and HBM paths) get work.
    tm = min(tm_target, _cdiv(_cdiv(rows, 2), sub) * sub)
    nb = _cdiv(rows, tm)
    if nb > 1 and nb % 2 == 1:
        tm_even = max(sub, _cdiv(_cdiv(rows, nb + 1), sub) * sub)
        if _cdiv(rows, tm_even) % 2 == 0:
            tm = tm_even
    return tm


def _bwd_call(alpha, g):
    """grad_input = -alpha * grad_output."""
    dtype = g.dtype
    total = int(g.size)
    itemsize = jnp.dtype(dtype).itemsize
    sub = max(8, 32 // itemsize)  # sublane multiple: 8 (f32), 16 (bf16), 32 (int8/fp8)

    neg_alpha_f32 = -jnp.asarray(alpha, dtype=jnp.float32)

    # Widest lane width (multiple of 128) that exactly divides the element count.
    lanes = next((l for l in _LANE_CANDIDATES if total >= l and total % l == 0), None)
    if lanes is None:
        # Ragged / tiny / empty sizes: one fused plain-JAX elementwise HBM pass
        # (no pad + slice copies).
        return (g.astype(jnp.float32) * neg_alpha_f32).astype(dtype)

    rows = total // lanes
    g2d = g.reshape(rows, lanes)
    tm = _pick_tile_rows(rows, lanes, itemsize, sub)
    num_blocks = _cdiv(rows, tm)

    alpha_arr = jnp.asarray(alpha, dtype=jnp.float32).reshape((1,))

    out2d = pl.pallas_call(
        _revgrad_bwd_kernel,
        out_shape=jax.ShapeDtypeStruct((rows, lanes), dtype),
        grid=(num_blocks,),
        in_specs=[
            pl.BlockSpec(memory_space=pltpu.MemorySpace.SMEM),   # alpha scalar
            pl.BlockSpec((tm, lanes), lambda i: (i, 0)),         # grad tile
        ],
        out_specs=pl.BlockSpec((tm, lanes), lambda i: (i, 0)),
        input_output_aliases={1: 0},   # reuse grad_output's HBM buffer for grad_input
        compiler_params=pltpu.CompilerParams(
            dimension_semantics=("parallel",),      # shard blocks across TCs on v7x
            vmem_limit_bytes=32 * 1024 * 1024,      # safe on v5e/v6e/v7x, ample headroom
        ),
    )(alpha_arr, g2d)

    return out2d.reshape(g.shape)


# ------------------------- RevGrad module equivalent ------------------------ #

@jax.custom_vjp
def _rev_grad_core(x, alpha):
    return x


def _rev_grad_fwd(x, alpha):
    return x, alpha


def _rev_grad_bwd(alpha, g):
    # grad wrt x = -alpha * g ; alpha is non-trainable -> zero cotangent.
    return _bwd_call(alpha, g), jnp.zeros_like(alpha)


_rev_grad_core.defvjp(_rev_grad_fwd, _rev_grad_bwd)


def rev_grad(x, alpha=1.0):
    """Forward: identity (no device work). Backward: -alpha * grad via Pallas."""
    return _rev_grad_core(x, jnp.asarray(alpha, dtype=jnp.float32))


class RevGrad:
    """JAX/Pallas equivalent of the PyTorch RevGrad module."""

    def __init__(self, alpha=1.0):
        # Non-trainable scalar, as in the torch module (a runtime operand, not a
        # compile-time constant -> no recompiles when alpha is annealed).
        self._alpha = jnp.asarray(alpha, dtype=jnp.float32)

    def __call__(self, x):
        return _rev_grad_core(x, self._alpha)


# ----------------------------------- main ----------------------------------- #

if __name__ == "__main__":
    key = jax.random.PRNGKey(0)
    # NCHW input consistent with a typical conv feature map.
    x = jax.random.normal(key, (2, 4, 16, 16), dtype=jnp.float32)

    module = RevGrad(alpha=1.0)

    # Forward pass (identity, no kernel launch).
    y = jax.block_until_ready(module(x))
    assert y.shape == x.shape and y.dtype == x.dtype
    assert bool(jnp.allclose(y, x)), "forward must be identity"

    # Backward path exercises the Pallas kernel: d/dx sum(2*y) reversed -> -2*alpha.
    grads = jax.block_until_ready(jax.grad(lambda inp: jnp.sum(module(inp) * 2.0))(x))
    assert bool(jnp.allclose(grads, -2.0 * jnp.ones_like(x))), "backward must be -alpha * grad"

    # Different alpha value reuses the same compiled kernel (alpha is an operand).
    grads_half = jax.block_until_ready(
        jax.grad(lambda inp: jnp.sum(RevGrad(0.5)(inp)))(x)
    )
    assert bool(jnp.allclose(grads_half, -0.5 * jnp.ones_like(x)))

    # bf16 gradient exercises the native-dtype multiply path.
    x_bf16 = jax.random.normal(key, (4, 8, 32), dtype=jnp.bfloat16)
    grads_bf16 = jax.block_until_ready(
        jax.grad(lambda inp: jnp.sum(module(inp).astype(jnp.float32)))(x_bf16)
    )
    assert grads_bf16.dtype == jnp.bfloat16
    assert bool(jnp.allclose(grads_bf16.astype(jnp.float32), -jnp.ones((4, 8, 32))))

    # Odd-sized tensor takes the fused plain-JAX fallback (no pad/slice copies).
    x_odd = jax.random.normal(key, (3, 5, 7), dtype=jnp.float32)
    grads_odd = jax.block_until_ready(jax.grad(lambda inp: jnp.sum(module(inp)))(x_odd))
    assert bool(jnp.allclose(grads_odd, -jnp.ones_like(x_odd)))

    print("KERNEL_OK")
</pallas_src>

<mosaic_0001>
module attributes {stable_mosaic.version = 11 : i64} {
  func.func @_revgrad_bwd_kernel(%arg0: i32, %arg1: memref<1xf32, #tpu.memory_space<smem>>, %arg2: memref<2x1024xf32, #tpu.memory_space<vmem>>, %arg3: memref<2x1024xf32, #tpu.memory_space<vmem>>) attributes {dimension_semantics = [#tpu.dimension_semantics<parallel>], iteration_bounds = array<i64: 1>, scalar_prefetch = 0 : i64, scratch_operands = 0 : i64, tpu.core_type = #tpu.core_type<tc>, window_params = [{transform_indices = @transform_0, window_bounds = array<i64: 1>}, {transform_indices = @transform_1, window_bounds = array<i64: 2, 1024>}, {transform_indices = @transform_2, window_bounds = array<i64: 2, 1024>}]} {
    %c0 = arith.constant 0 : index
    %0 = memref.load %arg1[%c0] : memref<1xf32, #tpu.memory_space<smem>>
    %cst = arith.constant 0.000000e+00 : f32
    %1 = arith.subf %cst, %0 : f32
    %c0_0 = arith.constant 0 : index
    %c0_1 = arith.constant 0 : index
    %2 = vector.load %arg2[%c0_0, %c0_1] : memref<2x1024xf32, #tpu.memory_space<vmem>>, vector<2x1024xf32>
    %3 = vector.broadcast %1 : f32 to vector<2x1024xf32>
    %4 = arith.mulf %2, %3 : vector<2x1024xf32>
    %c0_2 = arith.constant 0 : index
    %c0_3 = arith.constant 0 : index
    %5 = vector.load %arg3[%c0_2, %c0_3] : memref<2x1024xf32, #tpu.memory_space<vmem>>, vector<2x1024xf32>
    tpu.vector_store %arg3[%c0_2, %c0_3], %4 {strides = array<i32>} : memref<2x1024xf32, #tpu.memory_space<vmem>>, vector<2x1024xf32>,
    return
  }
  func.func @transform_0(%arg0: i32) -> i32 {
    %c0_i32 = arith.constant 0 : i32
    %c0_i32_0 = arith.constant 0 : i32
    return %c0_i32 : i32
  }
  func.func @transform_1(%arg0: i32) -> (i32, i32) {
    %c0_i32 = arith.constant 0 : i32
    %c0_i32_0 = arith.constant 0 : i32
    return %arg0, %c0_i32 : i32, i32
  }
  func.func @transform_2(%arg0: i32) -> (i32, i32) {
    %c0_i32 = arith.constant 0 : i32
    %c0_i32_0 = arith.constant 0 : i32
    return %arg0, %c0_i32 : i32, i32
  }
}

</mosaic_0001>

<bundles_post_ra>
// kernel: tpu_custom_call.1
= control target key start
LH: loop header
LB: loop body
LE: loop exit
PB: predicated region body
PF: predicated region fallthrough
CT: control target
= control target key end

     0   :  { %8 = vsyncpa [#allocation4], 0  ;;  %s143_s0 = inlined_call_operand.<no memory space> [shape: f32[1], index: 0, kind: input, shape index: {}]   ;;  %s144_s1 = inlined_call_operand.hbm [shape: f32[2,1024], index: 1, kind: input, shape index: {}, may-alias: {1,2}]   ;;  %s145_s2 = inlined_call_operand.hbm [shape: f32[2,1024], index: 2, kind: output, shape index: {}, may-alias: {1,2}]  }
   0x1   :  { %9 = vsyncpa [#allocation5], 0  ;;  %s99_s9 = smov [#allocation3]   ;;  %s51_s13 = scalar_lea.hbm %s144_s1, 256 }
   0x2   :  { %s18_s10 = sshll.u32 %s99_s9, 4  ;;  %p52_p0 = scmp.ne.s32.totalorder %s144_s1, %s51_s13  ;;  %s19_s10 = int_to_ptr.vmem [resolvable:$true] %s18_s10 }
   0x3   :  { %p55_p1 = scmp.lt.u32.totalorder %s51_s13, %s144_s1 }
   0x5   :  { %p57_p2 = pnand %p55_p1, %p52_p0 }
   0x7   :  { %60 = shalt.err (!%p57_p2)
}
   0x8   :  { %s61_s18 = scalar_lea.vmem %s19_s10, 256  ;;  %p66_p4 = scmp.lt.s32.totalorder %s19_s10, %s19_s10 }
   0x9   :  { %p62_p3 = scmp.ne.s32.totalorder %s19_s10, %s61_s18  ;;  %p67_p5 = scmp.lt.s32.totalorder %s61_s18, %s61_s18 }
   0xb   :  { %p68_p6 = por %p67_p5, %p66_p4 }
   0xd   :  { %p69_p7 = pnand %p68_p6, %p62_p3 }
   0xf   :  { %72 = shalt.err (!%p69_p7)
}
  0x10   :  { %21 = dma.hbm_to_vmem [thread:$0]  %s144_s1, 256, %s19_s10, [#allocation4]  }
  0x11   :  { %95 = dma.done.wait [#allocation4], 256  }
  0x12   :  { %96 = vsyncadd [#allocation4], 4294967040  ;;  %s26_s23 = ssub.f32 0.0, %s143_s0  ;;  %s100_s24 = smov [#allocation6]   ;;  %v27_v1 = vld [vmem:[#allocation3] sm:$0xff]  ;;  %v28_v2 = vld [vmem:[#allocation3 + $0x8] sm:$0xff] }
  0x13   :  { %s40_s25 = sshll.u32 %s100_s24, 4  ;;  %s41_s25 = int_to_ptr.vmem [resolvable:$true] %s40_s25 }
  0x14   :  { %v29_v0 = vstv %s26_s23  ;;  %s73_s26 = scalar_lea.vmem %s41_s25, 256  ;;  %p78_p9 = scmp.lt.s32.totalorder %s41_s25, %s41_s25 }
  0x15   :  { %v30_v3 = vmul.f32 %v29_v0, %v27_v1  ;;  %v31_v4 = vmul.f32 %v29_v0, %v28_v2  ;;  %p74_p8 = scmp.ne.s32.totalorder %s41_s25, %s73_s26  ;;  %p79_p10 = scmp.lt.s32.totalorder %s73_s26, %s73_s26 }
  0x17   :  { %32 = vst [vmem:[#allocation6] sm:$0xff] %v30_v3  ;;  %33 = vst [vmem:[#allocation6 + $0x8] sm:$0xff] %v31_v4  ;;  %p80_p11 = por %p79_p10, %p78_p9 }
  0x19   :  { %p81_p12 = pnand %p80_p11, %p74_p8 }
  0x1b   :  { %84 = shalt.err (!%p81_p12)
}
  0x1c   :  { %s85_s0 = scalar_lea.hbm %s145_s2, 256 }
  0x1d   :  { %p86_p13 = scmp.ne.s32.totalorder %s145_s2, %s85_s0  ;;  %p89_p0 = scmp.lt.u32.totalorder %s85_s0, %s145_s2 }
  0x1f   :  { %p91_p1 = pnand %p89_p0, %p86_p13 }
  0x21   :  { %94 = shalt.err (!%p91_p1)
}
  0x22   :  { %43 = dma.vmem_to_hbm [thread:$0]  %s41_s25, 256, %s145_s2, [#allocation5]  }
  0x23   :  { %97 = dma.done.wait [#allocation5], 256  }
  0x24   :  { %98 = vsyncadd [#allocation5], 4294967040 }
  0x25   :  { %47 = vsyncpa [#allocation4], 1 }
  0x26   :  { %48 = vsyncpa [#allocation5], 1 }

</bundles_post_ra>
